<compile_context>
chip_gen: v6e
topology: v6e:2x2x1
jax: 0.10.0
libtpu: 0.0.40
codegen_flags: <defaults>
</compile_context>

<pallas_src>
import functools

import jax
import jax.numpy as jnp
from jax.experimental import pallas as pl
from jax.experimental.pallas import tpu as pltpu

LANE = 128        # lane width / padded feature dim for all layers
MAX_TB = 2048     # max batch-tile rows (sweep 1024-4096; 2048 amortizes step overhead)
MIN_SPLIT = 16    # only split the batch grid when there are >= 16 (padded) rows


def _round_up(a, m):
    return ((a + m - 1) // m) * m


def _choose_tiling(batch):
    """Return (TB, B_pad, n_steps).

    * pad the batch only to a multiple of 8 rows (plus at most 8*(n_steps-1)
      extra rows so the tile divides evenly) -- never up to a whole tile,
    * guarantee >= 2 grid steps whenever the batch is big enough so the
      "parallel" axis shards across both TensorCores on v7x,
    * cap the tile at MAX_TB rows.
    """
    b8 = _round_up(max(batch, 1), 8)
    if b8 < MIN_SPLIT:
        return b8, b8, 1
    n_steps = max(2, pl.cdiv(b8, MAX_TB))
    tb = _round_up(pl.cdiv(b8, n_steps), 8)
    return tb, n_steps * tb, n_steps


def mlp_kernel(x_ref, w_ref, b_ref, o_ref):
    # x_ref: (TB, F_pad)      input tile (features zero-padded to F_pad)
    # w_ref: (4, 128, 128)    packed, ZERO-padded weights (resident)
    # b_ref: (8, 128)         rows 0..3 = biases of layers 1..4 (resident)
    # o_ref: (TB, out_feat)   output tile (narrow / masked store)
    f_in = x_ref.shape[1]

    # Layer 1: (TB, F_pad) @ (F_pad, 128) -> lane-dense (TB, 128) accumulator.
    h = jnp.dot(x_ref[...], w_ref[0, :f_in, :],
                preferred_element_type=jnp.float32)
    h = jnp.tanh(h + b_ref[0:1, :])

    # Layers 2 and 3 stay in the same (TB, 128) working buffer. Zero-padded
    # lanes stay exactly zero because the weight/bias slabs are zero there
    # and tanh(0) == 0.
    for l in (1, 2):
        h = jnp.dot(h, w_ref[l], preferred_element_type=jnp.float32)
        h = jnp.tanh(h + b_ref[l:l + 1, :])

    # Layer 4 + sigmoid; store only the real output lanes.
    h = jnp.dot(h, w_ref[3], preferred_element_type=jnp.float32)
    z = h + b_ref[3:4, :]
    n_out = o_ref.shape[1]
    o_ref[...] = jax.nn.sigmoid(z[:, :n_out]).astype(o_ref.dtype)


@functools.partial(jax.jit, static_argnums=(3,))
def mlp_forward(x, w_slab, b_slab, out_features):
    B, F = x.shape
    assert F <= LANE, "input_features must be <= 128 for this packed kernel"
    assert out_features <= LANE, "output_features must be <= 128"

    F_pad = _round_up(F, 8)
    TB, B_pad, n_steps = _choose_tiling(B)

    cdtype = w_slab.dtype
    itemsz = jnp.dtype(cdtype).itemsize

    # Skip the wrapper-side pad copy entirely when x is already aligned.
    if B_pad == B and F_pad == F and x.dtype == cdtype:
        x_p = x
    else:
        x_p = jnp.zeros((B_pad, F_pad), cdtype).at[:B, :F].set(x.astype(cdtype))

    cost = pl.CostEstimate(
        flops=2 * B_pad * (F_pad * LANE + 3 * LANE * LANE),
        transcendentals=B_pad * 4 * LANE,                     # 3x tanh + sigmoid
        bytes_accessed=(B_pad * F_pad * itemsz                # x
                        + 4 * LANE * LANE * itemsz            # W slab
                        + 8 * LANE * itemsz                   # bias slab
                        + B_pad * out_features * 4))          # output

    vmem_est = (2 * TB * F_pad * itemsz          # double-buffered x tile
                + 2 * TB * out_features * 4      # double-buffered out tile
                + 4 * LANE * LANE * itemsz       # resident weights
                + 8 * LANE * itemsz)             # resident biases
    compiler_kwargs = dict(dimension_semantics=("parallel",))
    if vmem_est > (12 << 20):
        # Only needed if tiles grow toward v5e's 16 MiB scoped-VMEM default.
        compiler_kwargs["vmem_limit_bytes"] = int(2 * vmem_est)

    out = pl.pallas_call(
        mlp_kernel,
        out_shape=jax.ShapeDtypeStruct((B_pad, out_features), jnp.float32),
        grid=(n_steps,),
        in_specs=[
            pl.BlockSpec((TB, F_pad), lambda i: (i, 0)),         # batch-tiled x
            pl.BlockSpec((4, LANE, LANE), lambda i: (0, 0, 0)),  # resident W slab
            pl.BlockSpec((8, LANE), lambda i: (0, 0)),           # resident bias slab
        ],
        out_specs=pl.BlockSpec((TB, out_features), lambda i: (i, 0)),
        compiler_params=pltpu.CompilerParams(**compiler_kwargs),
        cost_estimate=cost,
    )(x_p, w_slab, b_slab)

    return out if B_pad == B else out[:B]


def pack_params(w1, b1, w2, b2, w3, b3, w4, b4, dtype=jnp.float32):
    """Pack the 4 (in,out) weights + biases into zero-padded slabs.

    IMPORTANT: the slabs MUST be exactly zero outside the real sub-blocks
    (tanh(0)=0 keeps padded lanes inert between layers); never build them
    with jnp.empty or non-zero padding.
    """
    w_slab = jnp.zeros((4, LANE, LANE), dtype)
    b_slab = jnp.zeros((8, LANE), dtype)
    for l, (w, b) in enumerate([(w1, b1), (w2, b2), (w3, b3), (w4, b4)]):
        fi, fo = w.shape
        assert fi <= LANE and fo <= LANE, "layer dims must be <= 128"
        w_slab = w_slab.at[l, :fi, :fo].set(w.astype(dtype))
        b_slab = b_slab.at[l, :fo].set(b.reshape(-1).astype(dtype))
    return w_slab, b_slab


def init_params(key, input_features, output_features):
    """Deterministic init mimicking nn.Linear's U(-1/sqrt(fan_in), +1/sqrt(fan_in)).
    Weights are (in_features, out_features) (transposed vs PyTorch) so the
    kernel computes x @ W + b."""
    dims = [(input_features, 5), (5, 4), (4, 3), (3, output_features)]
    params = []
    for (fan_in, fan_out) in dims:
        key, kw, kb = jax.random.split(key, 3)
        bound = 1.0 / jnp.sqrt(fan_in)
        w = jax.random.uniform(kw, (fan_in, fan_out), jnp.float32, -bound, bound)
        b = jax.random.uniform(kb, (1, fan_out), jnp.float32, -bound, bound)
        params.extend([w, b])
    return params


def reference_forward(x, w1, b1, w2, b2, w3, b3, w4, b4):
    h = jnp.tanh(x @ w1 + b1)
    h = jnp.tanh(h @ w2 + b2)
    h = jnp.tanh(h @ w3 + b3)
    return jax.nn.sigmoid(h @ w4 + b4)


if __name__ == "__main__":
    key = jax.random.PRNGKey(0)
    key, kx = jax.random.split(key)

    batch = 24               # exercises the 2-step parallel grid + 8-row pad
    input_features = 16
    output_features = 2

    x = jax.random.normal(kx, (batch, input_features), jnp.float32)
    params = init_params(key, input_features, output_features)
    ref = reference_forward(x, *params)

    # Full-precision path (f32 operands, f32 accumulation).
    w_slab, b_slab = pack_params(*params)
    out = mlp_forward(x, w_slab, b_slab, output_features)
    out = jax.block_until_ready(out)
    assert out.shape == (batch, output_features)
    assert jnp.allclose(out, ref, atol=1e-5, rtol=1e-5), "f32 mismatch vs reference"

    # Optional bf16-operand path (bf16-native MXU on v6e/v7x), f32 accumulation.
    w_bf, b_bf = pack_params(*params, dtype=jnp.bfloat16)
    out_bf = mlp_forward(x, w_bf, b_bf, output_features)
    out_bf = jax.block_until_ready(out_bf)
    assert out_bf.shape == (batch, output_features)
    assert jnp.allclose(out_bf, ref, atol=5e-2, rtol=5e-2), "bf16 mismatch vs reference"

    print("KERNEL_OK")
</pallas_src>

<mosaic_0001>
module attributes {stable_mosaic.version = 11 : i64} {
  func.func @mlp_kernel(%arg0: i32, %arg1: memref<16x16xf32, #tpu.memory_space<vmem>>, %arg2: memref<4x128x128xf32, #tpu.memory_space<vmem>>, %arg3: memref<8x128xf32, #tpu.memory_space<vmem>>, %arg4: memref<16x2xf32, #tpu.memory_space<vmem>>) attributes {dimension_semantics = [#tpu.dimension_semantics<parallel>], iteration_bounds = array<i64: 2>, scalar_prefetch = 0 : i64, scratch_operands = 0 : i64, tpu.core_type = #tpu.core_type<tc>, window_params = [{transform_indices = @transform_0, window_bounds = array<i64: 16, 16>}, {pipeline_mode = #tpu.pipeline_mode<synchronous>, transform_indices = @transform_1, window_bounds = array<i64: 4, 128, 128>}, {pipeline_mode = #tpu.pipeline_mode<synchronous>, transform_indices = @transform_2, window_bounds = array<i64: 8, 128>}, {transform_indices = @transform_3, window_bounds = array<i64: 16, 2>}]} {
    %c0 = arith.constant 0 : index
    %c0_0 = arith.constant 0 : index
    %0 = vector.load %arg1[%c0, %c0_0] : memref<16x16xf32, #tpu.memory_space<vmem>>, vector<16x16xf32>
    %c0_1 = arith.constant 0 : index
    %c0_2 = arith.constant 0 : index
    %c0_3 = arith.constant 0 : index
    %1 = vector.load %arg2[%c0_1, %c0_2, %c0_3] : memref<4x128x128xf32, #tpu.memory_space<vmem>>, vector<1x16x128xf32>
    %2 = vector.shape_cast %1 : vector<1x16x128xf32> to vector<16x128xf32>
    %cst = arith.constant dense<0.000000e+00> : vector<16x128xf32>
    %3 = tpu.matmul %0, %2, %cst {dimension_numbers = #tpu.dot_dimension_numbers<[1], [0], [0], [1], [0, 0, 1, 1], [], []>} : vector<16x16xf32>, vector<16x128xf32>, vector<16x128xf32> -> vector<16x128xf32>
    %c0_4 = arith.constant 0 : index
    %c0_5 = arith.constant 0 : index
    %4 = vector.load %arg3[%c0_4, %c0_5] : memref<8x128xf32, #tpu.memory_space<vmem>>, vector<1x128xf32>
    %5 = vector.broadcast %4 : vector<1x128xf32> to vector<16x128xf32>
    %6 = arith.addf %3, %5 : vector<16x128xf32>
    %7 = math.tanh %6 : vector<16x128xf32>
    %c1 = arith.constant 1 : index
    %c0_6 = arith.constant 0 : index
    %c0_7 = arith.constant 0 : index
    %8 = vector.load %arg2[%c1, %c0_6, %c0_7] : memref<4x128x128xf32, #tpu.memory_space<vmem>>, vector<1x128x128xf32>
    %9 = vector.shape_cast %8 : vector<1x128x128xf32> to vector<128x128xf32>
    %cst_8 = arith.constant dense<0.000000e+00> : vector<16x128xf32>
    %10 = tpu.matmul %7, %9, %cst_8 {dimension_numbers = #tpu.dot_dimension_numbers<[1], [0], [0], [1], [0, 0, 1, 1], [], []>} : vector<16x128xf32>, vector<128x128xf32>, vector<16x128xf32> -> vector<16x128xf32>
    %c1_9 = arith.constant 1 : index
    %c0_10 = arith.constant 0 : index
    %11 = vector.load %arg3[%c1_9, %c0_10] : memref<8x128xf32, #tpu.memory_space<vmem>>, vector<1x128xf32>
    %12 = vector.broadcast %11 : vector<1x128xf32> to vector<16x128xf32>
    %13 = arith.addf %10, %12 : vector<16x128xf32>
    %14 = math.tanh %13 : vector<16x128xf32>
    %c2 = arith.constant 2 : index
    %c0_11 = arith.constant 0 : index
    %c0_12 = arith.constant 0 : index
    %15 = vector.load %arg2[%c2, %c0_11, %c0_12] : memref<4x128x128xf32, #tpu.memory_space<vmem>>, vector<1x128x128xf32>
    %16 = vector.shape_cast %15 : vector<1x128x128xf32> to vector<128x128xf32>
    %cst_13 = arith.constant dense<0.000000e+00> : vector<16x128xf32>
    %17 = tpu.matmul %14, %16, %cst_13 {dimension_numbers = #tpu.dot_dimension_numbers<[1], [0], [0], [1], [0, 0, 1, 1], [], []>} : vector<16x128xf32>, vector<128x128xf32>, vector<16x128xf32> -> vector<16x128xf32>
    %c2_14 = arith.constant 2 : index
    %c0_15 = arith.constant 0 : index
    %18 = vector.load %arg3[%c2_14, %c0_15] : memref<8x128xf32, #tpu.memory_space<vmem>>, vector<1x128xf32>
    %19 = vector.broadcast %18 : vector<1x128xf32> to vector<16x128xf32>
    %20 = arith.addf %17, %19 : vector<16x128xf32>
    %21 = math.tanh %20 : vector<16x128xf32>
    %c3 = arith.constant 3 : index
    %c0_16 = arith.constant 0 : index
    %c0_17 = arith.constant 0 : index
    %22 = vector.load %arg2[%c3, %c0_16, %c0_17] : memref<4x128x128xf32, #tpu.memory_space<vmem>>, vector<1x128x128xf32>
    %23 = vector.shape_cast %22 : vector<1x128x128xf32> to vector<128x128xf32>
    %cst_18 = arith.constant dense<0.000000e+00> : vector<16x128xf32>
    %24 = tpu.matmul %21, %23, %cst_18 {dimension_numbers = #tpu.dot_dimension_numbers<[1], [0], [0], [1], [0, 0, 1, 1], [], []>} : vector<16x128xf32>, vector<128x128xf32>, vector<16x128xf32> -> vector<16x128xf32>
    %c3_19 = arith.constant 3 : index
    %c0_20 = arith.constant 0 : index
    %25 = vector.load %arg3[%c3_19, %c0_20] : memref<8x128xf32, #tpu.memory_space<vmem>>, vector<1x128xf32>
    %26 = vector.broadcast %25 : vector<1x128xf32> to vector<16x128xf32>
    %27 = arith.addf %24, %26 : vector<16x128xf32>
    %28 = vector.extract_strided_slice %27 {offsets = [0, 0], sizes = [16, 2], strides = [1, 1]} : vector<16x128xf32> to vector<16x2xf32>
    %29 = arith.negf %28 : vector<16x2xf32>
    %30 = math.exp %29 : vector<16x2xf32>
    %cst_21 = arith.constant 1.000000e+00 : f32
    %31 = vector.broadcast %cst_21 : f32 to vector<16x2xf32>
    %32 = arith.addf %31, %30 : vector<16x2xf32>
    %33 = arith.divf %31, %32 : vector<16x2xf32>
    %c0_22 = arith.constant 0 : index
    %c0_23 = arith.constant 0 : index
    %34 = vector.load %arg4[%c0_22, %c0_23] : memref<16x2xf32, #tpu.memory_space<vmem>>, vector<16x2xf32>
    tpu.vector_store %arg4[%c0_22, %c0_23], %33 {strides = array<i32>} : memref<16x2xf32, #tpu.memory_space<vmem>>, vector<16x2xf32>,
    return
  }
  func.func @transform_0(%arg0: i32) -> (i32, i32) {
    %c0_i32 = arith.constant 0 : i32
    %c0_i32_0 = arith.constant 0 : i32
    return %arg0, %c0_i32 : i32, i32
  }
  func.func @transform_1(%arg0: i32) -> (i32, i32, i32) {
    %c0_i32 = arith.constant 0 : i32
    %c0_i32_0 = arith.constant 0 : i32
    %c0_i32_1 = arith.constant 0 : i32
    %c0_i32_2 = arith.constant 0 : i32
    return %c0_i32, %c0_i32_0, %c0_i32_1 : i32, i32, i32
  }
  func.func @transform_2(%arg0: i32) -> (i32, i32) {
    %c0_i32 = arith.constant 0 : i32
    %c0_i32_0 = arith.constant 0 : i32
    %c0_i32_1 = arith.constant 0 : i32
    return %c0_i32, %c0_i32_0 : i32, i32
  }
  func.func @transform_3(%arg0: i32) -> (i32, i32) {
    %c0_i32 = arith.constant 0 : i32
    %c0_i32_0 = arith.constant 0 : i32
    return %arg0, %c0_i32 : i32, i32
  }
}

</mosaic_0001>

<bundles_post_ra>
// kernel: mlp_forward.1
= control target key start
LH: loop header
LB: loop body
LE: loop exit
PB: predicated region body
PF: predicated region fallthrough
CT: control target
= control target key end

     0   :  { %8 = vsyncpa [#allocation3], 0  ;;  %s953_s12 = smov 0   ;;  %s1012_s0 = inlined_call_operand.vmem [shape: f32[32,16], index: 0, kind: input, shape index: {}]   ;;  %s1013_s1 = inlined_call_operand.hbm [shape: f32[4,128,128], index: 1, kind: input, shape index: {}]   ;;  %s1014_s2 = inlined_call_operand.vmem [shape: f32[8,128], index: 2, kind: input, shape index: {}]   ;;  %s1015_s3 = inlined_call_operand.vmem [shape: f32[32,2], index: 3, kind: output, shape index: {}]  }
   0x1 LB: > { %s660_s13 = sadd.s32 4294967295, %s928_s12   ;;  %p662_p0 = scmp.ge.s32.totalorder %s928_s12, 1  ;;  %s928_s12 = sphi %s953_s12, %s14_s12  }
   0x2   : > { %p113_p1 = scmp.lt.s32.totalorder %s928_s12, 3  ;;  %s930_s14 = smov [#allocation2]  }
   0x3   : > { %s125_s15 = sshll.u32 %s930_s14, 4  ;;  %p965_p3 = scmp.eq.s32.totalorder %s660_s13, 0  ;;  %s126_s15 = int_to_ptr.vmem [resolvable:$true] %s125_s15 }
   0x4   : > { %p961_p2 = pnand %p662_p0, %p113_p1  ;;  %s903_s18 = scalar_lea.vmem %s126_s15, 8192 }
   0x5   : > { %p904_p7 = scmp.ne.s32.totalorder %s126_s15, %s903_s18  ;;  %p911_p10 = scmp.lt.s32.totalorder %s126_s15, %s126_s15 }
   0x6   : > { %p855_p4 = pneg %p961_p2  ;;  %p912_p11 = scmp.lt.s32.totalorder %s903_s18, %s903_s18 }
   0x8   : > { %p856_p5 = pnand %p965_p3, %p855_p4  ;;  %p913_p12 = por %p912_p11, %p911_p10 }
   0xa   : > { %p894_p6 = pneg %p856_p5 }
   0xc   : > { %p906_p8 = pnand %p904_p7, %p894_p6 }
   0xe   : > { %p907_p9 = pneg %p906_p8 }
  0x10   : > { %p914_p13 = pnand %p913_p12, %p907_p9 }
  0x12   : > { %917 = shalt.err (!%p914_p13)
}
  0x13   : > { %s931_s19 = smov 128   ;;  %s932_s20 = smov 8  }
  0x14   : > { %858 = dma.hbm_to_vmem [thread:$0]  (!%p856_p5), %s1013_s1, 8192, %s126_s15, [#allocation3], %s931_s19, %s931_s19, %s932_s20  }
  0x15   : > { %153 = sbr.rel (%p961_p2) target bundleno = 902 (0x386), region = 32 }
  0x1a   : > { %923 = dma.done.wait (%p965_p3), [#allocation3], 8192  }
  0x1b   : > { %925 = vsyncadd (%p965_p3), [#allocation3], 4294959104  ;;  %s667_s23 = sshll.u32 %s660_s13, 1  ;;  %vm198_vm0 = vcmask 130048   ;;  %v192_v0 = vld [vmem:[#allocation2 + $0x8] sm:$0xff]  ;;  %v191_v1 = vld [vmem:[#allocation2] sm:$0xff] }
  0x1c   : > { %p178_p0 = scmp.lt.s32.totalorder %s667_s23, 3  ;;  %739 = vmatprep.subr.mxu0 %v192_v0  ;;  %v298_v3 = vld [vmem:[#allocation2 + $0xf8] sm:$0xff]  ;;  %v297_v4 = vld [vmem:[#allocation2 + $0xf0] sm:$0xff]  ;;  %v296_v6 = vld [vmem:[#allocation2 + $0xe8] sm:$0xff]  ;;  %vm589_vm1 = vcmask 15360  }
  0x1d   : > { %740 = vmatpush3.msra.mxu0 %v192_v0  ;;  %746 = vmatprep.subr.mxu1 %v298_v3  ;;  %v295_v7 = vld [vmem:[#allocation2 + $0xe0] sm:$0xff]  ;;  %v294_v8 = vld [vmem:[#allocation2 + $0xd8] sm:$0xff]  ;;  %v293_v9 = vld [vmem:[#allocation2 + $0xd0] sm:$0xff] }
  0x1e   : > { %s1019_s23 = smov (!%p178_p0, %s667_s23), 3  ;;  %741 = vmatprep.subr.mxu0 %v191_v1  ;;  %747 = vmatpush3.msra.mxu1 %v298_v3  ;;  %v292_v10 = vld [vmem:[#allocation2 + $0xc8] sm:$0xff]  ;;  %v291_v11 = vld [vmem:[#allocation2 + $0xc0] sm:$0xff]  ;;  %v290_v12 = vld [vmem:[#allocation2 + $0xb8] sm:$0xff] }
  0x1f   : > { %s668_s24 = sshll.u32 %s1019_s23, 3  ;;  %742 = vmatpush3.msra.mxu0 %v191_v1  ;;  %748 = vmatprep.subr.mxu1 %v297_v4  ;;  %v289_v13 = vld [vmem:[#allocation2 + $0xb0] sm:$0xff]  ;;  %v288_v14 = vld [vmem:[#allocation2 + $0xa8] sm:$0xff]  ;;  %v287_v15 = vld [vmem:[#allocation2 + $0xa0] sm:$0xff] }
  0x20   : > { %s181_s27 = scalar_lea.vmem %s1012_s0, %s668_s24  ;;  %749 = vmatpush3.msra.mxu1 %v297_v4  ;;  %v286_v16 = vld [vmem:[#allocation2 + $0x98] sm:$0xff]  ;;  %v285_v17 = vld [vmem:[#allocation2 + $0x90] sm:$0xff]  ;;  %v284_v18 = vld [vmem:[#allocation2 + $0x88] sm:$0xff]  ;;  %s187_s11 = scalar_lea.vmem %s1015_s3, %s668_s24 }
  0x21   : > { %v189_v2 = vld [vmem:[%s181_s27] sm:$0xff]  ;;  %v190_v5 = vld [vmem:[%s181_s27 + $0x8] sm:$0xff]  ;;  %750 = vmatprep.subr.mxu1 %v296_v6  ;;  %v397_v20 = vld [vmem:[#allocation2 + $0x178] sm:$0xff] }
  0x22   : > { %743 = vmatprep.mubr.msk.f32.mxu0 %vm198_vm0, %v189_v2  ;;  %751 = vmatpush3.msra.mxu1 %v296_v6  ;;  %v283_v19 = vld [vmem:[#allocation2 + $0x80] sm:$0xff]  ;;  %v396_v21 = vld [vmem:[#allocation2 + $0x170] sm:$0xff]  ;;  %v395_v22 = vld [vmem:[#allocation2 + $0x168] sm:$0xff] }
  0x23   : > { %744 = vmatmul.mubr.msk.f32.vlgmr.msra.gmra.mxu0 %vm198_vm0, %v190_v5  ;;  %752 = vmatprep.subr.mxu1 %v295_v7  ;;  %v394_v23 = vld [vmem:[#allocation2 + $0x160] sm:$0xff]  ;;  %v393_v24 = vld [vmem:[#allocation2 + $0x158] sm:$0xff]  ;;  %v392_v25 = vld [vmem:[#allocation2 + $0x150] sm:$0xff] }
  0x24   : > { %753 = vmatpush3.msra.mxu1 %v295_v7  ;;  %781 = vmatprep.subr.mxu0 %v397_v20  ;;  %v671_v26 = vld [vmem:[%s1014_s2] ss:$0 sm:$0xff]  ;;  %v391_v33 = vld [vmem:[#allocation2 + $0x148] sm:$0xff]  ;;  %v389_v35 = vld [vmem:[#allocation2 + $0x138] sm:$0xff] }
  0x25   : > { %754 = vmatprep.subr.mxu1 %v294_v8  ;;  %782 = vmatpush3.msra.mxu0 %v397_v20  ;;  %v390_v34 = vld [vmem:[#allocation2 + $0x140] sm:$0xff]  ;;  %v388_v36 = vld [vmem:[#allocation2 + $0x130] sm:$0xff]  ;;  %v387_v37 = vld [vmem:[#allocation2 + $0x128] sm:$0xff] }
  0x26   : > { %755 = vmatpush3.msra.mxu1 %v294_v8  ;;  %783 = vmatprep.subr.mxu0 %v396_v21  ;;  %v386_v38 = vld [vmem:[#allocation2 + $0x120] sm:$0xff]  ;;  %v385_v39 = vld [vmem:[#allocation2 + $0x118] sm:$0xff]  ;;  %v384_v40 = vld [vmem:[#allocation2 + $0x110] sm:$0xff] }
  0x27   : > { %756 = vmatprep.subr.mxu1 %v293_v9  ;;  %784 = vmatpush3.msra.mxu0 %v396_v21  ;;  %v383_v41 = vld [vmem:[#allocation2 + $0x108] sm:$0xff]  ;;  %v382_v42 = vld [vmem:[#allocation2 + $0x100] sm:$0xff]  ;;  %v496_v43 = vld [vmem:[#allocation2 + $0x1f8] sm:$0xff] }
  0x28   : > { %757 = vmatpush3.msra.mxu1 %v293_v9  ;;  %785 = vmatprep.subr.mxu0 %v395_v22  ;;  %v495_v44 = vld [vmem:[#allocation2 + $0x1f0] sm:$0xff]  ;;  %v494_v45 = vld [vmem:[#allocation2 + $0x1e8] sm:$0xff]  ;;  %v493_v46 = vld [vmem:[#allocation2 + $0x1e0] sm:$0xff] }
  0x29   : > { %758 = vmatprep.subr.mxu1 %v292_v10  ;;  %786 = vmatpush3.msra.mxu0 %v395_v22  ;;  %v492_v47 = vld [vmem:[#allocation2 + $0x1d8] sm:$0xff]  ;;  %v491_v48 = vld [vmem:[#allocation2 + $0x1d0] sm:$0xff]  ;;  %v674_v49 = vld [vmem:[%s1014_s2 + $0x1] ss:$0 sm:$0xff] }
  0x2a   : > { %759 = vmatpush3.msra.mxu1 %v292_v10  ;;  %787 = vmatprep.subr.mxu0 %v394_v23  ;;  %v490_v56 = vld [vmem:[#allocation2 + $0x1c8] sm:$0xff]  ;;  %v489_v57 = vld [vmem:[#allocation2 + $0x1c0] sm:$0xff]  ;;  %v488_v58 = vld [vmem:[#allocation2 + $0x1b8] sm:$0xff] }
  0x2b   : > { %760 = vmatprep.subr.mxu1 %v291_v11  ;;  %788 = vmatpush3.msra.mxu0 %v394_v23  ;;  %v487_v59 = vld [vmem:[#allocation2 + $0x1b0] sm:$0xff]  ;;  %v486_v60 = vld [vmem:[#allocation2 + $0x1a8] sm:$0xff]  ;;  %v485_v61 = vld [vmem:[#allocation2 + $0x1a0] sm:$0xff] }
  0x2c   : > { %761 = vmatpush3.msra.mxu1 %v291_v11  ;;  %789 = vmatprep.subr.mxu0 %v393_v24  ;;  %v484_v62 = vld [vmem:[#allocation2 + $0x198] sm:$0xff]  ;;  %v483_v63 = vld [vmem:[#allocation2 + $0x190] sm:$0xff]  ;;  %v482_v0 = vld [vmem:[#allocation2 + $0x188] sm:$0xff] }
  0x2d   : > { %762 = vmatprep.subr.mxu1 %v290_v12  ;;  %790 = vmatpush3.msra.mxu0 %v393_v24  ;;  %v481_v1 = vld [vmem:[#allocation2 + $0x180] sm:$0xff] }
  0x2e   : > { %763 = vmatpush3.msra.mxu1 %v290_v12  ;;  %791 = vmatprep.subr.mxu0 %v392_v25  ;;  %v675_v2 = vld [vmem:[%s1014_s2 + $0x2] ss:$0 sm:$0xff]  ;;  %v676_v9 = vld [vmem:[%s1014_s2 + $0x3] ss:$0 sm:$0xff] }
  0x2f   : > { %764 = vmatprep.subr.mxu1 %v289_v13  ;;  %792 = vmatpush3.msra.mxu0 %v392_v25 }
  0x30   : > { %765 = vmatpush3.msra.mxu1 %v289_v13  ;;  %793 = vmatprep.subr.mxu0 %v391_v33 }
  0x31   : > { %766 = vmatprep.subr.mxu1 %v288_v14  ;;  %794 = vmatpush3.msra.mxu0 %v391_v33 }
  0x32   : > { %767 = vmatpush3.msra.mxu1 %v288_v14  ;;  %795 = vmatprep.subr.mxu0 %v390_v34 }
  0x33   : > { %768 = vmatprep.subr.mxu1 %v287_v15  ;;  %796 = vmatpush3.msra.mxu0 %v390_v34 }
  0x34   : > { %769 = vmatpush3.msra.mxu1 %v287_v15  ;;  %797 = vmatprep.subr.mxu0 %v389_v35 }
  0x35   : > { %770 = vmatprep.subr.mxu1 %v286_v16  ;;  %798 = vmatpush3.msra.mxu0 %v389_v35 }
  0x36   : > { %771 = vmatpush3.msra.mxu1 %v286_v16  ;;  %799 = vmatprep.subr.mxu0 %v388_v36 }
  0x37   : > { %772 = vmatprep.subr.mxu1 %v285_v17  ;;  %800 = vmatpush3.msra.mxu0 %v388_v36 }
  0x38   : > { %773 = vmatpush3.msra.mxu1 %v285_v17  ;;  %801 = vmatprep.subr.mxu0 %v387_v37 }
  0x39   : > { %774 = vmatprep.subr.mxu1 %v284_v18  ;;  %802 = vmatpush3.msra.mxu0 %v387_v37 }
  0x3a   : > { %775 = vmatpush3.msra.mxu1 %v284_v18  ;;  %803 = vmatprep.subr.mxu0 %v386_v38 }
  0x3b   : > { %776 = vmatprep.subr.mxu1 %v283_v19  ;;  %804 = vmatpush3.msra.mxu0 %v386_v38 }
  0x3c   : > { %777 = vmatpush3.msra.mxu1 %v283_v19  ;;  %805 = vmatprep.subr.mxu0 %v385_v39 }
  0x3d   : > { %806 = vmatpush3.msra.mxu0 %v385_v39  ;;  %816 = vmatprep.subr.mxu1 %v496_v43 }
  0x3e   : > { %807 = vmatprep.subr.mxu0 %v384_v40 }
  0x3f   : > { %808 = vmatpush3.msra.mxu0 %v384_v40 }
  0x40   : > { %809 = vmatprep.subr.mxu0 %v383_v41 }
  0x41   : > { %810 = vmatpush3.msra.mxu0 %v383_v41 }
  0x42   : > { %811 = vmatprep.subr.mxu0 %v382_v42 }
  0x43   : > { %812 = vmatpush3.msra.mxu0 %v382_v42 }
  0xe3   : > { %v745_v27 = vpop.f32.mrf.mxu0 }
  0xe4   : > { %v277_v28 = vadd.f32 %v745_v27, %v671_v26 }
  0xe5   : > { %v271_v29 = vpop.f32.mrf.mxu0 }
  0xe6   : > { %v272_v30 = vadd.f32 %v671_v26, %v271_v29 }
  0xe8   : > { %872 = vtanh.f32 %v272_v30 }
  0xe9   : > { %874 = vtanh.f32 %v277_v28 }
  0xf5   : > { %v873_v31 = vpop.eup %872 }
  0xf6   : > { %v875_v32 = vpop.eup %874  ;;  %778 = vmatprep.mubr.f32.mxu1 %v873_v31 }
  0xf7   : > { %779 = vmatmul.mubr.f32.vlgmr.msra.gmra.mxu1 %v875_v32 }
  0xf8   : > { %817 = vmatpush3.msra.mxu1 %v496_v43 }
  0xf9   : > { %818 = vmatprep.subr.mxu1 %v495_v44 }
  0xfa   : > { %819 = vmatpush3.msra.mxu1 %v495_v44 }
  0xfb   : > { %820 = vmatprep.subr.mxu1 %v494_v45 }
  0xfc   : > { %821 = vmatpush3.msra.mxu1 %v494_v45 }
  0xfd   : > { %822 = vmatprep.subr.mxu1 %v493_v46 }
  0xfe   : > { %823 = vmatpush3.msra.mxu1 %v493_v46 }
  0xff   : > { %824 = vmatprep.subr.mxu1 %v492_v47 }
 0x100   : > { %825 = vmatpush3.msra.mxu1 %v492_v47 }
 0x101   : > { %826 = vmatprep.subr.mxu1 %v491_v48 }
 0x102   : > { %827 = vmatpush3.msra.mxu1 %v491_v48 }
 0x103   : > { %828 = vmatprep.subr.mxu1 %v490_v56 }
 0x104   : > { %829 = vmatpush3.msra.mxu1 %v490_v56 }
 0x105   : > { %830 = vmatprep.subr.mxu1 %v489_v57 }
 0x106   : > { %831 = vmatpush3.msra.mxu1 %v489_v57 }
 0x107   : > { %832 = vmatprep.subr.mxu1 %v488_v58 }
 0x108   : > { %833 = vmatpush3.msra.mxu1 %v488_v58 }
 0x109   : > { %834 = vmatprep.subr.mxu1 %v487_v59 }
 0x10a   : > { %835 = vmatpush3.msra.mxu1 %v487_v59 }
 0x10b   : > { %836 = vmatprep.subr.mxu1 %v486_v60 }
 0x10c   : > { %837 = vmatpush3.msra.mxu1 %v486_v60 }
 0x10d   : > { %838 = vmatprep.subr.mxu1 %v485_v61 }
 0x10e   : > { %839 = vmatpush3.msra.mxu1 %v485_v61 }
 0x10f   : > { %840 = vmatprep.subr.mxu1 %v484_v62 }
 0x110   : > { %841 = vmatpush3.msra.mxu1 %v484_v62 }
 0x111   : > { %842 = vmatprep.subr.mxu1 %v483_v63 }
 0x112   : > { %843 = vmatpush3.msra.mxu1 %v483_v63 }
 0x113   : > { %844 = vmatprep.subr.mxu1 %v482_v0 }
 0x114   : > { %845 = vmatpush3.msra.mxu1 %v482_v0 }
 0x115   : > { %846 = vmatprep.subr.mxu1 %v481_v1 }
 0x116   : > { %847 = vmatpush3.msra.mxu1 %v481_v1 }
 0x1b7   : > { %v780_v50 = vpop.f32.mrf.mxu1 }
 0x1b8   : > { %v376_v51 = vadd.f32 %v780_v50, %v674_v49 }
 0x1b9   : > { %v370_v52 = vpop.f32.mrf.mxu1 }
 0x1ba   : > { %v371_v53 = vadd.f32 %v674_v49, %v370_v52 }
 0x1bc   : > { %876 = vtanh.f32 %v371_v53 }
 0x1bd   : > { %878 = vtanh.f32 %v376_v51 }
 0x1c9   : > { %v877_v54 = vpop.eup %876 }
 0x1ca   : > { %v879_v55 = vpop.eup %878  ;;  %813 = vmatprep.mubr.f32.mxu0 %v877_v54 }
 0x1cb   : > { %814 = vmatmul.mubr.f32.vlgmr.msra.gmra.mxu0 %v879_v55 }
 0x28b   : > { %v815_v3 = vpop.f32.mrf.mxu0 }
 0x28c   : > { %v475_v4 = vadd.f32 %v815_v3, %v675_v2 }
 0x28d   : > { %v469_v5 = vpop.f32.mrf.mxu0 }
 0x28e   : > { %v470_v6 = vadd.f32 %v675_v2, %v469_v5 }
 0x290   : > { %880 = vtanh.f32 %v470_v6 }
 0x291   : > { %882 = vtanh.f32 %v475_v4 }
 0x29d   : > { %v881_v7 = vpop.eup %880 }
 0x29e   : > { %v883_v8 = vpop.eup %882  ;;  %848 = vmatprep.mubr.f32.mxu1 %v881_v7 }
 0x29f   : > { %849 = vmatmul.mubr.f32.vlgmr.msra.gmra.mxu1 %v883_v8 }
 0x35f   : > { %v850_v10 = vpop.f32.mrf.mxu1 }
 0x360   : > { %v574_v11 = vadd.f32 %v850_v10, %v676_v9 }
 0x361   : > { %v568_v12 = vpop.f32.mrf.mxu1 }
 0x362   : > { %v678_v13 = vmul.f32 -1.442695, %v574_v11  ;;  %v569_v14 = vadd.f32 %v676_v9, %v568_v12 }
 0x364   : > { %884 = vpow2.f32 %v678_v13  ;;  %v677_v15 = vmul.f32 -1.442695, %v569_v14 }
 0x366   : > { %886 = vpow2.f32 %v677_v15 }
 0x371   : > { %v885_v16 = vpop.eup %884 }
 0x372   : > { %v584_v18 = vadd.f32 1.0, %v885_v16 }
 0x373   : > { %v887_v17 = vpop.eup %886 }
 0x374   : > { %v583_v19 = vadd.f32 1.0, %v887_v17 }
 0x376   : > { %888 = vrcp.f32 %v583_v19 }
 0x377   : > { %890 = vrcp.f32 %v584_v18 }
 0x383   : > { %v889_v20 = vpop.eup %888 }
 0x384   : > { %v891_v21 = vpop.eup %890  ;;  %590 = vst.msk [vmem:[%s187_s11] sm:$0xff] %vm589_vm1, %v889_v20 }
 0x385   : > { %591 = vst.msk [vmem:[%s187_s11 + $0x8] sm:$0xff] %vm589_vm1, %v891_v21 }
 0x386 PF: > { %s14_s12 = sadd.s32 1, %s928_s12  }
 0x387   : > { %p11_p1 = scmp.ge.s32.totalorder %s14_s12, 4  }
 0x389   :  { %13 = sbr.rel (!%p11_p1) target bundleno = 1 (0x1), region = 70 }
 0x38e   :  { %614 = vsyncpa [#allocation3], 1 }
 0x38f   :  { %616 = vsyncpa [#allocation3 + $0x1], 1 }

</bundles_post_ra>
